<compile_context>
chip_gen: v7x
topology: tpu7x:2x2x1
jax: 0.10.0
libtpu: 0.0.40
codegen_flags: <defaults>
</compile_context>

<pallas_src>
import math

import jax
import jax.numpy as jnp
from jax.experimental import pallas as pl
from jax.experimental.pallas import tpu as pltpu


# ----- module hyperparameters (attention2d(in_planes, kernel_size, stride,
#        n_basis_kernels, temperature, reduction, pool_dim='freq')) -----
IN_PLANES = 4
KERNEL_SIZE = 3
STRIDE = 1
N_BASIS_KERNELS = 4
TEMPERATURE = 31.0
REDUCTION = 4
POOL_DIM = "freq"

HIDDEN = max(IN_PLANES // REDUCTION, 4)
PADDING = (KERNEL_SIZE - 1) // 2
BN_EPS = 1e-5


def _attention2d_freq_kernel(a_ref, w1_ref, scale_ref, shift_ref, w2_ref, b2_ref,
                             out_ref):
    """Fused conv1d(as one matmul) -> BN -> ReLU -> 1x1 conv -> softmax-over-K.

    a_ref     : (k*C, N_BLK)  im2col-stacked, freq-pooled input columns
                              (column n = flattened (batch, out-time) index)
    w1_ref    : (H, k*C)      conv1d1 weight, tap-major columns
    scale_ref : (H, 1)        folded BatchNorm scale  (gamma / sqrt(var+eps))
    shift_ref : (H, 1)        folded BatchNorm shift  (beta - mean*scale)
    w2_ref    : (K, H)        conv1d2 weight, pre-divided by temperature
    b2_ref    : (K, 1)        conv1d2 bias,   pre-divided by temperature
    out_ref   : (K, N_BLK)    softmax over K (axis 0), lane-dense store
    """
    # conv1d1 over all taps/channels as a single contraction with lane-wide N.
    h = jnp.dot(w1_ref[...], a_ref[...], preferred_element_type=jnp.float32)
    # BatchNorm (eval mode, folded to affine) + ReLU.
    # TODO(synk): PyTorch training-mode BN (batch statistics) is not replicated;
    #             eval-mode running-stat BN is used.
    h = jnp.maximum(h * scale_ref[...] + shift_ref[...], 0.0)
    # 1x1 conv (already scaled by 1/temperature) + bias.
    logits = jnp.dot(w2_ref[...], h, preferred_element_type=jnp.float32) + b2_ref[...]
    # softmax over the basis-kernel axis (axis 0 of the (K, N_BLK) tile).
    m = jnp.max(logits, axis=0, keepdims=True)
    e = jnp.exp(logits - m)
    s = jnp.sum(e, axis=0, keepdims=True)
    out_ref[...] = (e * pl.reciprocal(s, approx=True)).astype(out_ref.dtype)


def _choose_block_cols(n, cap=2048):
    """Pick a lane-dense (multiple-of-128) column block size <= cap."""
    if n <= 128:
        return n                      # tiny problem: single (sub-128) tile
    if n <= cap:
        return -(-n // 128) * 128     # one lane-dense tile, minimal padding
    return cap


def attention2d_freq(x, w1, bn_gamma, bn_beta, bn_mean, bn_var, w2, b2,
                     *, kernel_size=KERNEL_SIZE, stride=STRIDE,
                     temperature=TEMPERATURE, eps=BN_EPS, block_cols=None):
    """x: [B, C, T, F] (NCHW).  Returns softmax attention of shape [B, K, 1, T', 1]."""
    B, C, T, F = x.shape
    pad = (kernel_size - 1) // 2
    t_out = (T + 2 * pad - kernel_size) // stride + 1
    H = w1.shape[0]
    K = w2.shape[0]

    # ---- glue: the only pass over the big tensor is the fused XLA freq-mean ----
    xp = jnp.mean(x.astype(jnp.float32), axis=3)                    # (B, C, T)
    xpad = jnp.pad(xp, ((0, 0), (0, 0), (pad, pad)))                # (B, C, T+2p)  tiny
    # im2col tap stacking on the tiny pooled tensor (stride folded in here).
    taps = [xpad[:, :, dk: dk + (t_out - 1) * stride + 1: stride]
            for dk in range(kernel_size)]                           # k x (B, C, T')
    a = jnp.stack(taps, axis=0)                                     # (k, B, C, T')
    a = jnp.transpose(a, (0, 2, 1, 3)).reshape(kernel_size * C, B * t_out)

    # Fold BatchNorm (eval mode) into affine scale/shift.
    inv_std = 1.0 / jnp.sqrt(bn_var.astype(jnp.float32) + eps)
    scale = (bn_gamma * inv_std).reshape(H, 1).astype(jnp.float32)
    shift = (bn_beta - bn_mean * bn_gamma * inv_std).reshape(H, 1).astype(jnp.float32)

    # conv1d1 weight (H, C, k) -> tap-major (H, k*C), matching rows of `a`.
    w1m = jnp.transpose(w1, (0, 2, 1)).reshape(H, kernel_size * C).astype(jnp.float32)
    # Fold the softmax 1/temperature into the last linear layer.
    w2s = (w2 / temperature).astype(jnp.float32)
    b2s = (b2 / temperature).reshape(K, 1).astype(jnp.float32)

    # ---- lane-dense column blocking over the flattened (B*T') axis ----
    n = B * t_out
    n_blk = block_cols if block_cols is not None else _choose_block_cols(n)
    n_pad = -(-n // n_blk) * n_blk
    if n_pad != n:
        a = jnp.pad(a, ((0, 0), (0, n_pad - n)))     # tiny zero columns, dropped later
    kc = kernel_size * C

    att_flat = pl.pallas_call(
        _attention2d_freq_kernel,
        out_shape=jax.ShapeDtypeStruct((K, n_pad), jnp.float32),
        grid=(n_pad // n_blk,),
        in_specs=[
            pl.BlockSpec((kc, n_blk), lambda i: (0, i)),
            pl.BlockSpec((H, kc), lambda i: (0, 0)),
            pl.BlockSpec((H, 1), lambda i: (0, 0)),
            pl.BlockSpec((H, 1), lambda i: (0, 0)),
            pl.BlockSpec((K, H), lambda i: (0, 0)),
            pl.BlockSpec((K, 1), lambda i: (0, 0)),
        ],
        out_specs=pl.BlockSpec((K, n_blk), lambda i: (0, i)),
        compiler_params=pltpu.CompilerParams(
            dimension_semantics=("parallel",)),
    )(a, w1m, scale, shift, w2s, b2s)

    # (K, B*T') -> (B, K, 1, T', 1); wrapper reshape/transpose of the tiny output.
    att = att_flat[:, :n].reshape(K, B, t_out)
    att = jnp.transpose(att, (1, 0, 2))
    return att[:, :, None, :, None]


def attention2d_freq_reference(x, w1, bn_gamma, bn_beta, bn_mean, bn_var, w2, b2,
                               *, kernel_size=KERNEL_SIZE, stride=STRIDE,
                               temperature=TEMPERATURE, eps=BN_EPS):
    """Pure-JAX reference of the same forward (eval-mode BN)."""
    B, C, T, F = x.shape
    pad = (kernel_size - 1) // 2
    t_out = (T + 2 * pad - kernel_size) // stride + 1
    xp = jnp.mean(x, axis=3)                                        # (B, C, T)
    xpad = jnp.pad(xp, ((0, 0), (0, 0), (pad, pad)))
    patches = jnp.stack(
        [xpad[:, :, dk: dk + (t_out - 1) * stride + 1: stride]
         for dk in range(kernel_size)], axis=0)                     # (k, B, C, T')
    h = jnp.einsum('hck,kbct->bht', w1, patches)
    scale = bn_gamma / jnp.sqrt(bn_var + eps)
    shift = bn_beta - bn_mean * scale
    h = h * scale[None, :, None] + shift[None, :, None]
    h = jnp.maximum(h, 0.0)
    o = jnp.einsum('kh,bht->bkt', w2, h) + b2[None, :, None]
    att = jax.nn.softmax(o / temperature, axis=1)
    return att[:, :, None, :, None]


if __name__ == "__main__":
    key = jax.random.PRNGKey(0)
    k_x, k_w1, k_w2 = jax.random.split(key, 3)

    B, T, F = 16, 16, 16
    x = jax.random.normal(k_x, (B, IN_PLANES, T, F), dtype=jnp.float32)

    # Deterministic parameter init mimicking the module's __init__:
    #   conv weights: kaiming_normal_(mode='fan_out', nonlinearity='relu')
    #   conv1d2 bias: 0 ; BN weight=1, bias=0, running stats (0, 1)
    std1 = math.sqrt(2.0 / (HIDDEN * KERNEL_SIZE))
    std2 = math.sqrt(2.0 / (N_BASIS_KERNELS * 1))
    w1 = std1 * jax.random.normal(k_w1, (HIDDEN, IN_PLANES, KERNEL_SIZE), jnp.float32)
    w2 = std2 * jax.random.normal(k_w2, (N_BASIS_KERNELS, HIDDEN), jnp.float32)
    b2 = jnp.zeros((N_BASIS_KERNELS,), jnp.float32)
    bn_gamma = jnp.ones((HIDDEN,), jnp.float32)
    bn_beta = jnp.zeros((HIDDEN,), jnp.float32)
    bn_mean = jnp.zeros((HIDDEN,), jnp.float32)
    bn_var = jnp.ones((HIDDEN,), jnp.float32)

    ref = attention2d_freq_reference(x, w1, bn_gamma, bn_beta, bn_mean, bn_var, w2, b2)
    ref = jax.block_until_ready(ref)

    # Single lane-dense block: N = B*T' = 256 -> grid=(1,), block (K, 256).
    out = attention2d_freq(x, w1, bn_gamma, bn_beta, bn_mean, bn_var, w2, b2)
    out = jax.block_until_ready(out)
    assert out.shape == (B, N_BASIS_KERNELS, 1, T, 1), out.shape
    # Tolerance loosened slightly for the approx-reciprocal softmax epilogue.
    assert jnp.allclose(out, ref, rtol=1e-3, atol=1e-3), float(jnp.max(jnp.abs(out - ref)))

    # Multi-step grid path: block_cols=128 -> grid=(2,), exercises the index_map.
    out2 = attention2d_freq(x, w1, bn_gamma, bn_beta, bn_mean, bn_var, w2, b2,
                            block_cols=128)
    out2 = jax.block_until_ready(out2)
    assert jnp.allclose(out2, ref, rtol=1e-3, atol=1e-3), float(jnp.max(jnp.abs(out2 - ref)))

    print("KERNEL_OK")
</pallas_src>

<mosaic_0001>
module attributes {stable_mosaic.version = 11 : i64} {
  func.func @_attention2d_freq_kernel(%arg0: i32, %arg1: memref<12x256xf32, #tpu.memory_space<vmem>>, %arg2: memref<4x12xf32, #tpu.memory_space<vmem>>, %arg3: memref<4x1xf32, #tpu.memory_space<vmem>>, %arg4: memref<4x1xf32, #tpu.memory_space<vmem>>, %arg5: memref<4x4xf32, #tpu.memory_space<vmem>>, %arg6: memref<4x1xf32, #tpu.memory_space<vmem>>, %arg7: memref<4x256xf32, #tpu.memory_space<vmem>>) attributes {dimension_semantics = [#tpu.dimension_semantics<parallel>], iteration_bounds = array<i64: 1>, scalar_prefetch = 0 : i64, scratch_operands = 0 : i64, tpu.core_type = #tpu.core_type<tc>, window_params = [{transform_indices = @transform_0, window_bounds = array<i64: 12, 256>}, {pipeline_mode = #tpu.pipeline_mode<synchronous>, transform_indices = @transform_1, window_bounds = array<i64: 4, 12>}, {pipeline_mode = #tpu.pipeline_mode<synchronous>, transform_indices = @transform_2, window_bounds = array<i64: 4, 1>}, {pipeline_mode = #tpu.pipeline_mode<synchronous>, transform_indices = @transform_3, window_bounds = array<i64: 4, 1>}, {pipeline_mode = #tpu.pipeline_mode<synchronous>, transform_indices = @transform_4, window_bounds = array<i64: 4, 4>}, {pipeline_mode = #tpu.pipeline_mode<synchronous>, transform_indices = @transform_5, window_bounds = array<i64: 4, 1>}, {transform_indices = @transform_6, window_bounds = array<i64: 4, 256>}]} {
    %c0 = arith.constant 0 : index
    %c0_0 = arith.constant 0 : index
    %0 = vector.load %arg2[%c0, %c0_0] : memref<4x12xf32, #tpu.memory_space<vmem>>, vector<4x12xf32>
    %c0_1 = arith.constant 0 : index
    %c0_2 = arith.constant 0 : index
    %1 = vector.load %arg1[%c0_1, %c0_2] : memref<12x256xf32, #tpu.memory_space<vmem>>, vector<12x256xf32>
    %cst = arith.constant dense<0.000000e+00> : vector<4x256xf32>
    %2 = tpu.matmul %0, %1, %cst {dimension_numbers = #tpu.dot_dimension_numbers<[1], [0], [0], [1], [0, 0, 1, 1], [], []>} : vector<4x12xf32>, vector<12x256xf32>, vector<4x256xf32> -> vector<4x256xf32>
    %c0_3 = arith.constant 0 : index
    %c0_4 = arith.constant 0 : index
    %3 = vector.load %arg3[%c0_3, %c0_4] : memref<4x1xf32, #tpu.memory_space<vmem>>, vector<4x1xf32>
    %4 = vector.broadcast %3 : vector<4x1xf32> to vector<4x256xf32>
    %5 = arith.mulf %2, %4 : vector<4x256xf32>
    %c0_5 = arith.constant 0 : index
    %c0_6 = arith.constant 0 : index
    %6 = vector.load %arg4[%c0_5, %c0_6] : memref<4x1xf32, #tpu.memory_space<vmem>>, vector<4x1xf32>
    %7 = vector.broadcast %6 : vector<4x1xf32> to vector<4x256xf32>
    %8 = arith.addf %5, %7 : vector<4x256xf32>
    %cst_7 = arith.constant 0.000000e+00 : f32
    %9 = vector.broadcast %cst_7 : f32 to vector<4x256xf32>
    %10 = arith.maximumf %8, %9 : vector<4x256xf32>
    %c0_8 = arith.constant 0 : index
    %c0_9 = arith.constant 0 : index
    %11 = vector.load %arg5[%c0_8, %c0_9] : memref<4x4xf32, #tpu.memory_space<vmem>>, vector<4x4xf32>
    %cst_10 = arith.constant dense<0.000000e+00> : vector<4x256xf32>
    %12 = tpu.matmul %11, %10, %cst_10 {dimension_numbers = #tpu.dot_dimension_numbers<[1], [0], [0], [1], [0, 0, 1, 1], [], []>} : vector<4x4xf32>, vector<4x256xf32>, vector<4x256xf32> -> vector<4x256xf32>
    %c0_11 = arith.constant 0 : index
    %c0_12 = arith.constant 0 : index
    %13 = vector.load %arg6[%c0_11, %c0_12] : memref<4x1xf32, #tpu.memory_space<vmem>>, vector<4x1xf32>
    %14 = vector.broadcast %13 : vector<4x1xf32> to vector<4x256xf32>
    %15 = arith.addf %12, %14 : vector<4x256xf32>
    %cst_13 = arith.constant dense<0xFF800000> : vector<256xf32>
    %16 = vector.multi_reduction <maximumf>, %15, %cst_13 [0] : vector<4x256xf32> to vector<256xf32>
    %17 = vector.shape_cast %16 : vector<256xf32> to vector<1x256xf32>
    %18 = vector.broadcast %17 : vector<1x256xf32> to vector<4x256xf32>
    %19 = arith.subf %15, %18 : vector<4x256xf32>
    %20 = math.exp %19 : vector<4x256xf32>
    %cst_14 = arith.constant dense<0.000000e+00> : vector<256xf32>
    %21 = vector.multi_reduction <add>, %20, %cst_14 [0] : vector<4x256xf32> to vector<256xf32>
    %22 = vector.shape_cast %21 : vector<256xf32> to vector<1x256xf32>
    %23 = tpu.reciprocal %22 {approx = true} : vector<1x256xf32> -> vector<1x256xf32>
    %24 = vector.broadcast %23 : vector<1x256xf32> to vector<4x256xf32>
    %25 = arith.mulf %20, %24 : vector<4x256xf32>
    %c0_15 = arith.constant 0 : index
    %c0_16 = arith.constant 0 : index
    %26 = vector.load %arg7[%c0_15, %c0_16] : memref<4x256xf32, #tpu.memory_space<vmem>>, vector<4x256xf32>
    tpu.vector_store %arg7[%c0_15, %c0_16], %25 {strides = array<i32>} : memref<4x256xf32, #tpu.memory_space<vmem>>, vector<4x256xf32>,
    return
  }
  func.func @transform_0(%arg0: i32) -> (i32, i32) {
    %c0_i32 = arith.constant 0 : i32
    %c0_i32_0 = arith.constant 0 : i32
    return %c0_i32, %arg0 : i32, i32
  }
  func.func @transform_1(%arg0: i32) -> (i32, i32) {
    %c0_i32 = arith.constant 0 : i32
    %c0_i32_0 = arith.constant 0 : i32
    %c0_i32_1 = arith.constant 0 : i32
    return %c0_i32, %c0_i32_0 : i32, i32
  }
  func.func @transform_2(%arg0: i32) -> (i32, i32) {
    %c0_i32 = arith.constant 0 : i32
    %c0_i32_0 = arith.constant 0 : i32
    %c0_i32_1 = arith.constant 0 : i32
    return %c0_i32, %c0_i32_0 : i32, i32
  }
  func.func @transform_3(%arg0: i32) -> (i32, i32) {
    %c0_i32 = arith.constant 0 : i32
    %c0_i32_0 = arith.constant 0 : i32
    %c0_i32_1 = arith.constant 0 : i32
    return %c0_i32, %c0_i32_0 : i32, i32
  }
  func.func @transform_4(%arg0: i32) -> (i32, i32) {
    %c0_i32 = arith.constant 0 : i32
    %c0_i32_0 = arith.constant 0 : i32
    %c0_i32_1 = arith.constant 0 : i32
    return %c0_i32, %c0_i32_0 : i32, i32
  }
  func.func @transform_5(%arg0: i32) -> (i32, i32) {
    %c0_i32 = arith.constant 0 : i32
    %c0_i32_0 = arith.constant 0 : i32
    %c0_i32_1 = arith.constant 0 : i32
    return %c0_i32, %c0_i32_0 : i32, i32
  }
  func.func @transform_6(%arg0: i32) -> (i32, i32) {
    %c0_i32 = arith.constant 0 : i32
    %c0_i32_0 = arith.constant 0 : i32
    return %c0_i32, %arg0 : i32, i32
  }
}

</mosaic_0001>

<bundles_post_ra>
// kernel: tpu_custom_call.1
= control target key start
LH: loop header
LB: loop body
LE: loop exit
PB: predicated region body
PF: predicated region fallthrough
CT: control target
= control target key end

     0   :  { %11 = vsyncpa [#allocation3], 0  ;;  %s454_s0 = inlined_call_operand.hbm [shape: f32[12,256], index: 0, kind: input, shape index: {}]   ;;  %s455_s1 = inlined_call_operand.vmem [shape: f32[4,12], index: 1, kind: input, shape index: {}]   ;;  %s456_s2 = inlined_call_operand.vmem [shape: f32[4,1], index: 2, kind: input, shape index: {}]   ;;  %s457_s3 = inlined_call_operand.vmem [shape: f32[4,1], index: 3, kind: input, shape index: {}]   ;;  %s458_s4 = inlined_call_operand.vmem [shape: f32[4,4], index: 4, kind: input, shape index: {}]   ;;  %s459_s5 = inlined_call_operand.vmem [shape: f32[4,1], index: 5, kind: input, shape index: {}]   ;;  %s460_s6 = inlined_call_operand.hbm [shape: f32[4,256], index: 6, kind: output, shape index: {}]  }
   0x1   :  { %12 = vsyncpa [#allocation4], 0  ;;  %s366_s21 = smov [#allocation2]   ;;  %s318_s25 = scalar_lea.hbm %s454_s0, 512 }
   0x2   :  { %s18_s22 = sshll.u32 %s366_s21, 4  ;;  %p319_p0 = scmp.ne.s32.totalorder %s454_s0, %s318_s25  ;;  %s19_s22 = int_to_ptr.vmem [resolvable:$true] %s18_s22 }
   0x3   :  { %p322_p1 = scmp.lt.u32.totalorder %s318_s25, %s454_s0 }
   0x5   :  { %p324_p2 = pnand %p322_p1, %p319_p0 }
   0x7   :  { %327 = shalt.err (!%p324_p2)
}
   0x8   :  { %s328_s30 = scalar_lea.vmem %s19_s22, 512  ;;  %p333_p4 = scmp.lt.s32.totalorder %s19_s22, %s19_s22 }
   0x9   :  { %p329_p3 = scmp.ne.s32.totalorder %s19_s22, %s328_s30  ;;  %p334_p5 = scmp.lt.s32.totalorder %s328_s30, %s328_s30 }
   0xb   :  { %p335_p6 = por %p334_p5, %p333_p4 }
   0xd   :  { %p336_p7 = pnand %p335_p6, %p329_p3 }
   0xf   :  { %339 = shalt.err (!%p336_p7)
}
  0x10   :  { %s367_s7 = smov 256   ;;  %s368_s8 = smov 16  }
  0x11   :  { %24 = dma.hbm_to_vmem [thread:$0]  %s454_s0, 512, %s19_s22, [#allocation3], %s367_s7, %s367_s7, %s368_s8  }
  0x12   :  { %362 = dma.done.wait [#allocation3], 512  }
  0x13   :  { %363 = vsyncadd [#allocation3], 4294966784  ;;  %v369_v0 = vmov 0.0   ;;  %v370_v1 = vmov 0   ;;  %vm47_vm0 = vcmask 1043456   ;;  %vm371_vm1 = vmmov 1  }
  0x14   :  { %118 = vmatprep.mubr.f32.mxu0 %v369_v0  ;;  %224 = vmatprep.mubr.f32.mxu1 %v369_v0  ;;  %vm296_vm2 = vmpackc.low %vm47_vm0, %vm371_vm1  ;;  %v40_v2 = vld [vmem:[#allocation2 + $0x8] sm:$0xff]  ;;  %v42_v3 = vld [vmem:[#allocation2 + $0x18] sm:$0xf]  ;;  %vm43_vm3 = vcmask 97280   ;;  %vm150_vm4 = vcmask 31744  }
  0x15   :  { %308 = vset.pattern.permute.xlu0 %v370_v1  ;;  %309 = vset.pattern.permute.xlu1 %v370_v1  ;;  %v39_v4 = vld [vmem:[#allocation2] sm:$0xff]  ;;  %v295_v5 = vpack.c.bf16 %v42_v3, %v40_v2  ;;  %v41_v6 = vld [vmem:[#allocation2 + $0x10] sm:$0xf] }
  0x16   :  { %v125_v7 = vld [vmem:[%s456_s2] sm:$0xf]  ;;  %v298_v8 = vpack.c.bf16 %v41_v6, %v39_v4 }
  0x17   :  { %128 = vperm.xlu0 %308, %v125_v7   ;;  %297 = vmatprep.subr.msk.bf16.mxu0 %vm296_vm2, %v295_v5  ;;  %v133_v9 = vld [vmem:[%s457_s3] sm:$0xf]  ;;  %s372_s3 = smov [#allocation5]  }
  0x18   :  { %300 = vmatpush1.bf16.msk.msra.mxu0 %vm296_vm2, %v298_v8  ;;  %v38_v10 = vld [vmem:[%s455_s1] sm:$0xf] }
  0x19   :  { %v144_v11 = vld [vmem:[%s459_s5] sm:$0xf] }
  0x1a   :  { %147 = vperm.xlu1 %309, %v144_v11   ;;  %v143_v22 = vld [vmem:[%s458_s4] sm:$0xf]  ;;  %s280_s4 = sshll.u32 %s372_s3, 4  ;;  %s281_s4 = int_to_ptr.vmem [resolvable:$true] %s280_s4 }
  0x1b   :  { %136 = vperm.xlu0 %308, %v133_v9   ;;  %291 = vmatmul.mubr.msk.f32.vlgmr.msra.gmra.mrb[0].mxu0 %vm43_vm3, %v38_v10  ;;  %s340_s5 = scalar_lea.vmem %s281_s4, 128  ;;  %p345_p9 = scmp.lt.s32.totalorder %s281_s4, %s281_s4 }
  0x1c   :  { %p341_p8 = scmp.ne.s32.totalorder %s281_s4, %s340_s5  ;;  %p346_p10 = scmp.lt.s32.totalorder %s340_s5, %s340_s5 }
  0x1e   :  { %p347_p11 = por %p346_p10, %p345_p9 }
  0x20   :  { %p348_p12 = pnand %p347_p11, %p341_p8 }
  0x96   :  { %v129_v12 = vpop.permute.xlu0 %128 }
  0x99   :  { %v148_v23 = vpop.permute.xlu1 %147 }
  0x9a   :  { %v137_v16 = vpop.permute.xlu0 %136 }
  0xee   :  { %v120_v13 = vpop.f32.mrb[0].mxu0 }
  0xef   :  { %v131_v14 = vmul.f32 %v129_v12, %v120_v13  ;;  %v122_v15 = vpop.f32.mrb[1].mxu0 }
  0xf0   :  { %v132_v17 = vmul.f32 %v129_v12, %v122_v15 }
  0xf1   :  { %v139_v18 = vadd.f32 %v137_v16, %v131_v14 }
  0xf2   :  { %v140_v19 = vadd.f32 %v137_v16, %v132_v17 }
  0xf3   :  { %v141_v21 = vmax.f32 %v139_v18, 0.0 }
  0xf4   :  { %v142_v20 = vmax.f32 %v140_v19, 0.0 }
  0xf6   :  { %292 = vmatprep.subr.msk.mxu1 %vm47_vm0, %v142_v20 }
  0xf7   :  { %293 = vmatpush1.msk.msra.mxu1 %vm47_vm0, %v141_v21 }
  0xf8   :  { %294 = vmatmul.mubr.msk.f32.vlgmr.msra.gmra.mrb[0].mxu1 %vm150_vm4, %v143_v22 }
 0x1cb   :  { %v226_v24 = vpop.f32.mrb[0].mxu1 }
 0x1cc   :  { %v227_v25 = vadd.f32 %v226_v24, %v148_v23  ;;  %v228_v26 = vpop.f32.mrb[1].mxu1 }
 0x1cd   :  { %v229_v27 = vadd.f32 %v228_v26, %v148_v23 }
 0x1ce   :  { %v231_v28 = vsel %vm47_vm0, %v227_v25, -inf }
 0x1cf   :  { %v232_v29 = vrot.slane %v231_v28, 4  ;;  %v238_v30 = vsel %vm47_vm0, %v229_v27, -inf }
 0x1d0   :  { %v239_v31 = vrot.slane %v238_v30, 4 }
 0x1d1   :  { %v233_v32 = vmax.f32 %v231_v28, %v232_v29 }
 0x1d2   :  { %v240_v33 = vmax.f32 %v238_v30, %v239_v31 }
 0x1d3   :  { %v234_v34 = vrot.slane %v233_v32, 2 }
 0x1d4   :  { %v241_v35 = vrot.slane %v240_v33, 2 }
 0x1d5   :  { %v235_v36 = vmax.f32 %v233_v32, %v234_v34 }
 0x1d6   :  { %v242_v37 = vmax.f32 %v240_v33, %v241_v35 }
 0x1d7   :  { %v236_v38 = vrot.slane %v235_v36, 1 }
 0x1d8   :  { %v243_v39 = vrot.slane %v242_v37, 1 }
 0x1d9   :  { %v237_v40 = vmax.f32 %v235_v36, %v236_v38 }
 0x1da   :  { %v244_v41 = vmax.f32 %v242_v37, %v243_v39 }
 0x1db   :  { %v245_v42 = vsub.f32 %v227_v25, %v237_v40 }
 0x1dc   :  { %v246_v43 = vsub.f32 %v229_v27, %v244_v41 }
 0x1dd   :  { %v247_v44 = vmul.f32 1.442695, %v245_v42 }
 0x1de   :  { %v249_v45 = vmul.f32 1.442695, %v246_v43 }
 0x1df   :  { %310 = vpow2.f32 %v247_v44 }
 0x1e0   :  { %312 = vpow2.f32 %v249_v45 }
 0x1e9   :  { %v311_v46 = vpop.eup %310 }
 0x1ea   :  { %v313_v47 = vpop.eup %312  ;;  %v251_v48 = vsel %vm47_vm0, %v311_v46, 0.0 }
 0x1eb   :  { %v252_v49 = vrot.slane %v251_v48, 4  ;;  %v258_v50 = vsel %vm47_vm0, %v313_v47, 0.0 }
 0x1ec   :  { %v259_v51 = vrot.slane %v258_v50, 4 }
 0x1ed   :  { %v253_v52 = vadd.f32 %v252_v49, %v251_v48 }
 0x1ee   :  { %v260_v53 = vadd.f32 %v259_v51, %v258_v50 }
 0x1ef   :  { %v254_v54 = vrot.slane %v253_v52, 2 }
 0x1f0   :  { %v261_v55 = vrot.slane %v260_v53, 2 }
 0x1f1   :  { %v255_v56 = vadd.f32 %v254_v54, %v253_v52 }
 0x1f2   :  { %v262_v57 = vadd.f32 %v261_v55, %v260_v53 }
 0x1f3   :  { %v256_v58 = vrot.slane %v255_v56, 1 }
 0x1f4   :  { %v263_v59 = vrot.slane %v262_v57, 1 }
 0x1f5   :  { %v257_v60 = vadd.f32 %v256_v58, %v255_v56 }
 0x1f6   :  { %v264_v61 = vadd.f32 %v263_v59, %v262_v57 }
 0x1f7   :  { %314 = vrcp.f32 %v257_v60 }
 0x1f8   :  { %316 = vrcp.f32 %v264_v61 }
 0x201   :  { %v315_v62 = vpop.eup %314 }
 0x202   :  { %v317_v63 = vpop.eup %316  ;;  %v267_v0 = vmul.f32 %v315_v62, %v311_v46 }
 0x203   :  { %v268_v1 = vmul.f32 %v317_v63, %v313_v47 }
 0x205   :  { %v271_v2 = vcombine.low %v267_v0, %v268_v1 }
 0x207   :  { %273 = vst [vmem:[#allocation5] sm:$0xff] %v271_v2 }
 0x208   :  { %351 = shalt.err (!%p348_p12)
}
 0x209   :  { %s352_s20 = scalar_lea.hbm %s460_s6, 128 }
 0x20a   :  { %p353_p13 = scmp.ne.s32.totalorder %s460_s6, %s352_s20  ;;  %p356_p0 = scmp.lt.u32.totalorder %s352_s20, %s460_s6 }
 0x20c   :  { %p358_p1 = pnand %p356_p0, %p353_p13 }
 0x20e   :  { %361 = shalt.err (!%p358_p1)
}
 0x20f   :  { %283 = dma.vmem_to_hbm [thread:$0]  %s281_s4, 128, %s460_s6, [#allocation4]  }
 0x210   :  { %364 = dma.done.wait [#allocation4], 128  }
 0x211   :  { %365 = vsyncadd [#allocation4], 4294967168 }
 0x212   :  { %287 = vsyncpa [#allocation3], 1 }
 0x213   :  { %288 = vsyncpa [#allocation4], 1 }

</bundles_post_ra>
